<compile_context>
chip_gen: v7x
topology: tpu7x:2x2x1
jax: 0.10.0
libtpu: 0.0.40
codegen_flags: <defaults>
</compile_context>

<pallas_src>
import jax
import jax.numpy as jnp
from jax.experimental import pallas as pl
from jax.experimental.pallas import tpu as pltpu

BETA = 1.0  # SoftDecisionTree.BETA


def branch_kernel(xs_ref, w_ref, b_ref, l_ref, d_ref, out_ref):
    """xs: (TB, F); w: (1, F) f32; b: (1, 1) scalar in SMEM;
    l: softmax(leaf_l) as (1, K); d: softmax(leaf_r) - softmax(leaf_l) as (1, K)."""
    xs = xs_ref[...].astype(jnp.float32)        # (TB, F), cast in-vreg if bf16
    w_row = w_ref[...]                          # (1, F), broadcast over batch
    b = b_ref[0, 0]                             # scalar bias from SMEM

    # Decision node: per-row dot on VPU (mul) + XLU (lane reduce) — MXU idle.
    z = jnp.sum(xs * w_row, axis=-1, keepdims=True) + b     # (TB, 1)
    ps = jax.nn.sigmoid(BETA * z)                            # (TB, 1), EUP

    # Mixture: (1-ps)*l + ps*r == l + ps*(r-l). Store only K live lanes.
    out_ref[...] = (l_ref[...] + ps * d_ref[...]).astype(out_ref.dtype)


def branch_forward(xs, w, b, leaf_l_params, leaf_r_params, *, block_b=2048):
    """xs: (B, F); w: torch Linear weight (1, F); b: (1,); leaf_*: (K,).
    Returns (B, K) output distributions, dtype matching xs."""
    xs = jnp.asarray(xs)
    B, F = xs.shape
    K = int(leaf_l_params.shape[0])
    out_dtype = xs.dtype

    # Batch-independent leaf softmaxes hoisted out of the kernel.
    l_dist = jax.nn.softmax(jnp.asarray(leaf_l_params, jnp.float32))
    r_dist = jax.nn.softmax(jnp.asarray(leaf_r_params, jnp.float32))
    l_row = l_dist.reshape(1, K)
    d_row = (r_dist - l_dist).reshape(1, K)

    # Batch tile: multiple of 8 (sublane), capped so double-buffered xs + out
    # tiles stay within a conservative VMEM budget on every generation
    # (v5e 16 MiB scoped default, v7x 64 MiB physical).
    vmem_budget = 12 * 1024 * 1024
    bytes_per_row = 2 * (F * xs.dtype.itemsize + K * jnp.dtype(out_dtype).itemsize)
    tb_cap = max(8, (vmem_budget // max(bytes_per_row, 1)) // 8 * 8)
    TB = max(8, min(block_b // 8 * 8, tb_cap, pl.cdiv(B, 8) * 8))
    grid = (pl.cdiv(B, TB),)  # ragged last block handled by Pallas; no jnp.pad

    w_row = jnp.asarray(w, jnp.float32).reshape(1, F)   # (1, F) weight row
    b_s = jnp.asarray(b, jnp.float32).reshape(1, 1)     # (1, 1) scalar -> SMEM

    out = pl.pallas_call(
        branch_kernel,
        out_shape=jax.ShapeDtypeStruct((B, K), out_dtype),
        grid=grid,
        in_specs=[
            pl.BlockSpec((TB, F), lambda i: (i, 0)),               # xs batch tile
            pl.BlockSpec((1, F), lambda i: (0, 0)),                # weight row (resident)
            pl.BlockSpec(memory_space=pltpu.MemorySpace.SMEM),     # bias scalar in SMEM
            pl.BlockSpec((1, K), lambda i: (0, 0)),                # left leaf dist
            pl.BlockSpec((1, K), lambda i: (0, 0)),                # right - left diff
        ],
        out_specs=pl.BlockSpec((TB, K), lambda i: (i, 0)),         # only K live lanes
        compiler_params=pltpu.CompilerParams(
            dimension_semantics=("parallel",)),  # v7x: shard batch tiles across TCs
    )(xs, w_row, b_s, l_row, d_row)

    return out


def branch_reference(xs, w, b, lp, rp):
    xs = jnp.asarray(xs, jnp.float32)
    z = xs @ jnp.asarray(w, jnp.float32).reshape(1, -1).T + jnp.asarray(b, jnp.float32).reshape(1, 1)
    ps = jax.nn.sigmoid(BETA * z)
    l_dist = jax.nn.softmax(jnp.asarray(lp, jnp.float32))[None, :]
    r_dist = jax.nn.softmax(jnp.asarray(rp, jnp.float32))[None, :]
    return (1.0 - ps) * l_dist + ps * r_dist


if __name__ == "__main__":
    # Deterministic parameter / input construction (no checkpoint loading).
    B, F, K = 8, 64, 10   # batch, in_features (w*h), num output classes
    key = jax.random.PRNGKey(0)
    k_x, k_w, k_b, k_l, k_r, k_x2 = jax.random.split(key, 6)

    xs = jax.random.normal(k_x, (B, F), jnp.float32)
    # torch.nn.Linear(in_features=F, out_features=1): weight (1, F), bias (1,)
    w = jax.random.normal(k_w, (1, F), jnp.float32) * 0.1
    b = jax.random.normal(k_b, (1,), jnp.float32) * 0.1
    # Leaf.dist_params ~ randn(k)
    leaf_l = jax.random.normal(k_l, (K,), jnp.float32)
    leaf_r = jax.random.normal(k_r, (K,), jnp.float32)

    out = branch_forward(xs, w, b, leaf_l, leaf_r)
    out = jax.block_until_ready(out)

    ref = branch_reference(xs, w, b, leaf_l, leaf_r)
    assert out.shape == (B, K)
    assert jnp.allclose(out, ref, atol=1e-5, rtol=1e-5), "mismatch vs reference"
    # Output rows are probability distributions (convex combo of softmaxes).
    assert jnp.allclose(out.sum(axis=-1), 1.0, atol=1e-5)

    # Ragged multi-step grid path (B not a multiple of TB, no wrapper pad).
    B2 = 20
    xs2 = jax.random.normal(k_x2, (B2, F), jnp.float32)
    out2 = jax.block_until_ready(branch_forward(xs2, w, b, leaf_l, leaf_r, block_b=8))
    ref2 = branch_reference(xs2, w, b, leaf_l, leaf_r)
    assert out2.shape == (B2, K)
    assert jnp.allclose(out2, ref2, atol=1e-5, rtol=1e-5), "ragged mismatch vs reference"

    print("KERNEL_OK")
</pallas_src>

<mosaic_0001>
module attributes {stable_mosaic.version = 11 : i64} {
  func.func @branch_kernel(%arg0: i32, %arg1: memref<8x64xf32, #tpu.memory_space<vmem>>, %arg2: memref<1x64xf32, #tpu.memory_space<vmem>>, %arg3: memref<1x1xf32, #tpu.memory_space<smem>>, %arg4: memref<1x10xf32, #tpu.memory_space<vmem>>, %arg5: memref<1x10xf32, #tpu.memory_space<vmem>>, %arg6: memref<8x10xf32, #tpu.memory_space<vmem>>) attributes {dimension_semantics = [#tpu.dimension_semantics<parallel>], iteration_bounds = array<i64: 1>, scalar_prefetch = 0 : i64, scratch_operands = 0 : i64, tpu.core_type = #tpu.core_type<tc>, window_params = [{transform_indices = @transform_0, window_bounds = array<i64: 8, 64>}, {pipeline_mode = #tpu.pipeline_mode<synchronous>, transform_indices = @transform_1, window_bounds = array<i64: 1, 64>}, {transform_indices = @transform_2, window_bounds = array<i64: 1, 1>}, {pipeline_mode = #tpu.pipeline_mode<synchronous>, transform_indices = @transform_3, window_bounds = array<i64: 1, 10>}, {pipeline_mode = #tpu.pipeline_mode<synchronous>, transform_indices = @transform_4, window_bounds = array<i64: 1, 10>}, {transform_indices = @transform_5, window_bounds = array<i64: 8, 10>}]} {
    %c0 = arith.constant 0 : index
    %c0_0 = arith.constant 0 : index
    %0 = vector.load %arg1[%c0, %c0_0] : memref<8x64xf32, #tpu.memory_space<vmem>>, vector<8x64xf32>
    %c0_1 = arith.constant 0 : index
    %c0_2 = arith.constant 0 : index
    %1 = vector.load %arg2[%c0_1, %c0_2] : memref<1x64xf32, #tpu.memory_space<vmem>>, vector<1x64xf32>
    %c0_3 = arith.constant 0 : index
    %c0_4 = arith.constant 0 : index
    %2 = memref.load %arg3[%c0_3, %c0_4] : memref<1x1xf32, #tpu.memory_space<smem>>
    %3 = vector.broadcast %1 : vector<1x64xf32> to vector<8x64xf32>
    %4 = arith.mulf %0, %3 : vector<8x64xf32>
    %cst = arith.constant dense<0.000000e+00> : vector<8xf32>
    %5 = vector.multi_reduction <add>, %4, %cst [1] : vector<8x64xf32> to vector<8xf32>
    %6 = vector.shape_cast %5 : vector<8xf32> to vector<8x1xf32>
    %7 = vector.broadcast %2 : f32 to vector<8x1xf32>
    %8 = arith.addf %6, %7 : vector<8x1xf32>
    %cst_5 = arith.constant 1.000000e+00 : f32
    %9 = vector.broadcast %cst_5 : f32 to vector<8x1xf32>
    %10 = arith.mulf %9, %8 : vector<8x1xf32>
    %11 = arith.negf %10 : vector<8x1xf32>
    %12 = math.exp %11 : vector<8x1xf32>
    %cst_6 = arith.constant 1.000000e+00 : f32
    %13 = vector.broadcast %cst_6 : f32 to vector<8x1xf32>
    %14 = arith.addf %13, %12 : vector<8x1xf32>
    %15 = arith.divf %13, %14 : vector<8x1xf32>
    %c0_7 = arith.constant 0 : index
    %c0_8 = arith.constant 0 : index
    %16 = vector.load %arg4[%c0_7, %c0_8] : memref<1x10xf32, #tpu.memory_space<vmem>>, vector<1x10xf32>
    %c0_9 = arith.constant 0 : index
    %c0_10 = arith.constant 0 : index
    %17 = vector.load %arg5[%c0_9, %c0_10] : memref<1x10xf32, #tpu.memory_space<vmem>>, vector<1x10xf32>
    %18 = vector.broadcast %15 : vector<8x1xf32> to vector<8x10xf32>
    %19 = vector.broadcast %17 : vector<1x10xf32> to vector<8x10xf32>
    %20 = arith.mulf %18, %19 : vector<8x10xf32>
    %21 = vector.broadcast %16 : vector<1x10xf32> to vector<8x10xf32>
    %22 = arith.addf %21, %20 : vector<8x10xf32>
    %c0_11 = arith.constant 0 : index
    %c0_12 = arith.constant 0 : index
    %23 = vector.load %arg6[%c0_11, %c0_12] : memref<8x10xf32, #tpu.memory_space<vmem>>, vector<8x10xf32>
    tpu.vector_store %arg6[%c0_11, %c0_12], %22 {strides = array<i32>} : memref<8x10xf32, #tpu.memory_space<vmem>>, vector<8x10xf32>,
    return
  }
  func.func @transform_0(%arg0: i32) -> (i32, i32) {
    %c0_i32 = arith.constant 0 : i32
    %c0_i32_0 = arith.constant 0 : i32
    return %arg0, %c0_i32 : i32, i32
  }
  func.func @transform_1(%arg0: i32) -> (i32, i32) {
    %c0_i32 = arith.constant 0 : i32
    %c0_i32_0 = arith.constant 0 : i32
    %c0_i32_1 = arith.constant 0 : i32
    return %c0_i32, %c0_i32_0 : i32, i32
  }
  func.func @transform_2(%arg0: i32) -> (i32, i32) {
    %c0_i32 = arith.constant 0 : i32
    %c0_i32_0 = arith.constant 0 : i32
    %c0_i32_1 = arith.constant 0 : i32
    return %c0_i32, %c0_i32_0 : i32, i32
  }
  func.func @transform_3(%arg0: i32) -> (i32, i32) {
    %c0_i32 = arith.constant 0 : i32
    %c0_i32_0 = arith.constant 0 : i32
    %c0_i32_1 = arith.constant 0 : i32
    return %c0_i32, %c0_i32_0 : i32, i32
  }
  func.func @transform_4(%arg0: i32) -> (i32, i32) {
    %c0_i32 = arith.constant 0 : i32
    %c0_i32_0 = arith.constant 0 : i32
    %c0_i32_1 = arith.constant 0 : i32
    return %c0_i32, %c0_i32_0 : i32, i32
  }
  func.func @transform_5(%arg0: i32) -> (i32, i32) {
    %c0_i32 = arith.constant 0 : i32
    %c0_i32_0 = arith.constant 0 : i32
    return %arg0, %c0_i32 : i32, i32
  }
}

</mosaic_0001>

<bundles_post_ra>
// kernel: tpu_custom_call.1
= control target key start
LH: loop header
LB: loop body
LE: loop exit
PB: predicated region body
PF: predicated region fallthrough
CT: control target
= control target key end

     0   :  { %11 = vsyncpa [#allocation4], 0  ;;  %s215_s0 = inlined_call_operand.hbm [shape: f32[8,64], index: 0, kind: input, shape index: {}]   ;;  %s216_s1 = inlined_call_operand.vmem [shape: f32[1,64], index: 1, kind: input, shape index: {}]   ;;  %s217_s2 = inlined_call_operand.<no memory space> [shape: f32[1,1], index: 2, kind: input, shape index: {}]   ;;  %s218_s3 = inlined_call_operand.vmem [shape: f32[1,10], index: 3, kind: input, shape index: {}]   ;;  %s219_s4 = inlined_call_operand.vmem [shape: f32[1,10], index: 4, kind: input, shape index: {}]   ;;  %s220_s5 = inlined_call_operand.hbm [shape: f32[8,10], index: 5, kind: output, shape index: {}]  }
   0x1   :  { %12 = vsyncpa [#allocation5], 0  ;;  %s147_s18 = smov [#allocation3]   ;;  %s99_s22 = scalar_lea.hbm %s215_s0, 128 }
   0x2   :  { %s19_s19 = sshll.u32 %s147_s18, 4  ;;  %p100_p0 = scmp.ne.s32.totalorder %s215_s0, %s99_s22  ;;  %s20_s19 = int_to_ptr.vmem [resolvable:$true] %s19_s19 }
   0x3   :  { %p103_p1 = scmp.lt.u32.totalorder %s99_s22, %s215_s0 }
   0x5   :  { %p105_p2 = pnand %p103_p1, %p100_p0 }
   0x7   :  { %108 = shalt.err (!%p105_p2)
}
   0x8   :  { %s109_s27 = scalar_lea.vmem %s20_s19, 128  ;;  %p114_p4 = scmp.lt.s32.totalorder %s20_s19, %s20_s19 }
   0x9   :  { %p110_p3 = scmp.ne.s32.totalorder %s20_s19, %s109_s27  ;;  %p115_p5 = scmp.lt.s32.totalorder %s109_s27, %s109_s27 }
   0xb   :  { %p116_p6 = por %p115_p5, %p114_p4 }
   0xd   :  { %p117_p7 = pnand %p116_p6, %p110_p3 }
   0xf   :  { %120 = shalt.err (!%p117_p7)
}
  0x10   :  { %22 = dma.hbm_to_vmem [thread:$0]  %s215_s0, 128, %s20_s19, [#allocation4]  }
  0x11   :  { %143 = dma.done.wait [#allocation4], 128  }
  0x12   :  { %144 = vsyncadd [#allocation4], 4294967168  ;;  %v34_v0 = vld [vmem:[#allocation3] sm:$0xff]  ;;  %vm44_vm0 = vcmask 523264   ;;  %v48_v4 = vstv %s217_s2  ;;  %s148_s11 = smov [#allocation6]   ;;  %vm72_vm1 = vcmask 80896  }
  0x13   :  { %v89_v1 = vld [vmem:[%s216_s1] ss:$0 sm:$0xff]  ;;  %s80_s12 = sshll.u32 %s148_s11, 4  ;;  %s81_s12 = int_to_ptr.vmem [resolvable:$true] %s80_s12 }
  0x14   :  { %v43_v2 = vmul.f32 %v89_v1, %v34_v0  ;;  %v91_v10 = vld [vmem:[%s219_s4] ss:$0 sm:$0xff]  ;;  %s121_s2 = scalar_lea.vmem %s81_s12, 128  ;;  %p126_p9 = scmp.lt.s32.totalorder %s81_s12, %s81_s12 }
  0x15   :  { %v92_v12 = vld [vmem:[%s218_s3] ss:$0 sm:$0xff]  ;;  %p122_p8 = scmp.ne.s32.totalorder %s81_s12, %s121_s2  ;;  %p127_p10 = scmp.lt.s32.totalorder %s121_s2, %s121_s2 }
  0x16   :  { %v45_v3 = vsel %vm44_vm0, %v43_v2, 0.0 }
  0x17   :  { %46 = vadd.xlane.f32.xlu0 %v45_v3  ;;  %p128_p11 = por %p127_p10, %p126_p9 }
  0x19   :  { %p129_p12 = pnand %p128_p11, %p122_p8 }
  0xa4   :  { %v47_v5 = vpop.xlane.xlu0 %46 }
  0xa5   :  { %v49_v6 = vadd.f32 %v48_v4, %v47_v5 }
  0xa7   :  { %v90_v7 = vmul.f32 -1.442695, %v49_v6 }
  0xa9   :  { %95 = vpow2.f32 %v90_v7 }
  0xb3   :  { %v96_v8 = vpop.eup %95 }
  0xb4   :  { %v53_v9 = vadd.f32 1.0, %v96_v8 }
  0xb6   :  { %97 = vrcp.f32 %v53_v9 }
  0xc0   :  { %v98_v11 = vpop.eup %97 }
  0xc1   :  { %v64_v13 = vmul.f32 %v98_v11, %v91_v10 }
  0xc3   :  { %v71_v14 = vadd.f32 %v92_v12, %v64_v13 }
  0xc5   :  { %73 = vst.msk [vmem:[#allocation6] sm:$0xff] %vm72_vm1, %v71_v14 }
  0xc6   :  { %132 = shalt.err (!%p129_p12)
}
  0xc7   :  { %s133_s14 = scalar_lea.hbm %s220_s5, 128 }
  0xc8   :  { %p134_p13 = scmp.ne.s32.totalorder %s220_s5, %s133_s14  ;;  %p137_p0 = scmp.lt.u32.totalorder %s133_s14, %s220_s5 }
  0xca   :  { %p139_p1 = pnand %p137_p0, %p134_p13 }
  0xcc   :  { %142 = shalt.err (!%p139_p1)
}
  0xcd   :  { %83 = dma.vmem_to_hbm [thread:$0]  %s81_s12, 128, %s220_s5, [#allocation5]  }
  0xce   :  { %145 = dma.done.wait [#allocation5], 128  }
  0xcf   :  { %146 = vsyncadd [#allocation5], 4294967168 }
  0xd0   :  { %87 = vsyncpa [#allocation4], 1 }
  0xd1   :  { %88 = vsyncpa [#allocation5], 1 }

</bundles_post_ra>
